<compile_context>
chip_gen: v7x
topology: tpu7x:2x2x1
jax: 0.10.0
libtpu: 0.0.40
codegen_flags: <defaults>
</compile_context>

<pallas_src>
import jax
import jax.numpy as jnp
from jax.experimental import pallas as pl
from jax.experimental.pallas import tpu as pltpu


def _round_up(x, m):
    return ((x + m - 1) // m) * m


def style_encoder_kernel(idx_ref, emb_ref, w_ref, b_ref, o_ref):
    """One batch tile per grid step.

    idx_ref: (TB, 1)  int32 style ids for this tile
    emb_ref: (S, H)   bf16 embedding table   (index-invariant -> VMEM resident)
    w_ref:   (H, Lp)  bf16 projection weight (resident)
    b_ref:   (1, Lp)  f32  projection bias   (resident)
    o_ref:   (TB, Lp) f32  output tile (lane-dense, Lp multiple of 128)
    """
    tb = idx_ref.shape[0]
    s = emb_ref.shape[0]

    idx = idx_ref[...]                                         # (TB, 1) int32

    # Bulk embedding gather as a one-hot matmul on the MXU: (TB,S)@(S,H).
    # Exact copy of bf16 rows (single nonzero product per output element,
    # accumulated in f32).
    row_ids = jax.lax.broadcasted_iota(jnp.int32, (tb, s), 1)  # (TB, S)
    one_hot = (row_ids == idx).astype(emb_ref.dtype)           # (TB, S) bf16
    h = jnp.dot(one_hot, emb_ref[...],
                preferred_element_type=jnp.float32)            # (TB, H) f32

    # TODO(synk): dropout is identity in eval mode; training-mode dropout would
    # use pltpu.prng_seed + pltpu.stateful_bernoulli with 1/(1-p) scaling here.

    # Projection on the MXU with f32 accumulation; bias add stays f32
    # (v5e VPU has no bf16). Cast of h back to bf16 is lossless: values are
    # bf16 table entries.
    y = jnp.dot(h.astype(w_ref.dtype), w_ref[...],
                preferred_element_type=jnp.float32) + b_ref[...]
    o_ref[...] = y.astype(o_ref.dtype)                         # (TB, Lp)


def style_encoder_forward(indices, embedding, w_proj, b_proj, *, block_b=256):
    """
    indices:   (B,) integer style ids
    embedding: (num_styles, hidden_dim) f32
    w_proj:    (hidden_dim, latent_dim) f32 (transposed vs. PyTorch Linear.weight)
    b_proj:    (latent_dim,) f32
    returns:   (B, latent_dim) f32
    """
    B = indices.shape[0]
    S, H = embedding.shape
    Hw, L = w_proj.shape
    assert Hw == H, f"w_proj must be (hidden_dim, latent_dim); got {w_proj.shape}"
    assert b_proj.shape == (L,), f"b_proj must be (latent_dim,); got {b_proj.shape}"

    # Batch tile: 256 fills the v6e/v7x 256-row MXU (128 is enough on v5e);
    # clamp so a tiny batch does not pay for a mostly-padded tile.
    TB = min(block_b, _round_up(B, 8))
    Bp = _round_up(B, TB)            # pad batch to a whole number of tiles
    Lp = _round_up(L, 128)           # lane-dense output / weight / bias

    # bf16 table & weight (native MXU dtype, half the resident bytes);
    # bias and accumulation stay f32.
    emb = embedding.astype(jnp.bfloat16)                                  # (S, H)
    w = jnp.pad(w_proj.astype(jnp.bfloat16), ((0, 0), (0, Lp - L)))       # (H, Lp)
    b = jnp.pad(b_proj.astype(jnp.float32), (0, Lp - L)).reshape(1, Lp)   # (1, Lp)
    idx = jnp.pad(indices.astype(jnp.int32), (0, Bp - B)).reshape(Bp, 1)  # (Bp, 1)

    grid = (Bp // TB,)
    out = pl.pallas_call(
        style_encoder_kernel,
        out_shape=jax.ShapeDtypeStruct((Bp, Lp), jnp.float32),
        grid_spec=pltpu.PrefetchScalarGridSpec(
            num_scalar_prefetch=0,
            grid=grid,
            in_specs=[
                pl.BlockSpec((TB, 1), lambda i: (i, 0)),    # per-tile ids
                pl.BlockSpec((S, H), lambda i: (0, 0)),     # resident table
                pl.BlockSpec((H, Lp), lambda i: (0, 0)),    # resident weight
                pl.BlockSpec((1, Lp), lambda i: (0, 0)),    # resident bias
            ],
            out_specs=pl.BlockSpec((TB, Lp), lambda i: (i, 0)),
        ),
        compiler_params=pltpu.CompilerParams(
            # Batch-tile axis is embarrassingly parallel -> shards tiles across
            # v7x's two TensorCores when the grid has >= 2 steps; neutral on
            # v5e/v6e.
            dimension_semantics=("parallel",)),
    )(idx, emb, w, b)

    return out[:B, :L]


if __name__ == "__main__":
    # Small shapes consistent with the module's forward.
    num_styles = 10
    hidden_dim = 32
    latent_dim = 16
    batch = 2

    key = jax.random.PRNGKey(0)
    k_emb, k_w, k_b, k_idx = jax.random.split(key, 4)

    # Deterministic synthetic parameters (nn.Embedding / nn.Linear shapes).
    embedding = jax.random.normal(k_emb, (num_styles, hidden_dim), jnp.float32)
    # PyTorch Linear.weight is (latent_dim, hidden_dim); store transposed.
    w_proj = (jax.random.normal(k_w, (latent_dim, hidden_dim), jnp.float32) * 0.1).T
    b_proj = jax.random.normal(k_b, (latent_dim,), jnp.float32) * 0.01

    indices = jax.random.randint(k_idx, (batch,), 0, num_styles, jnp.int32)

    out = style_encoder_forward(indices, embedding, w_proj, b_proj)
    out = jax.block_until_ready(out)

    # Pure-JAX reference (eval-mode dropout = identity), with the same bf16
    # rounding of table/weight that the kernel applies.
    emb_bf = embedding.astype(jnp.bfloat16).astype(jnp.float32)
    w_bf = w_proj.astype(jnp.bfloat16).astype(jnp.float32)
    ref = emb_bf[indices] @ w_bf + b_proj

    assert out.shape == (batch, latent_dim)
    assert jnp.allclose(out, ref, atol=2e-3, rtol=2e-3)

    print("KERNEL_OK")
</pallas_src>

<mosaic_0001>
module attributes {stable_mosaic.version = 11 : i64} {
  func.func @style_encoder_kernel(%arg0: i32, %arg1: memref<8x1xi32, #tpu.memory_space<vmem>>, %arg2: memref<10x32xbf16, #tpu.memory_space<vmem>>, %arg3: memref<32x128xbf16, #tpu.memory_space<vmem>>, %arg4: memref<1x128xf32, #tpu.memory_space<vmem>>, %arg5: memref<8x128xf32, #tpu.memory_space<vmem>>) attributes {dimension_semantics = [#tpu.dimension_semantics<parallel>], iteration_bounds = array<i64: 1>, scalar_prefetch = 0 : i64, scratch_operands = 0 : i64, tpu.core_type = #tpu.core_type<tc>, window_params = [{transform_indices = @transform_0, window_bounds = array<i64: 8, 1>}, {pipeline_mode = #tpu.pipeline_mode<synchronous>, transform_indices = @transform_1, window_bounds = array<i64: 10, 32>}, {pipeline_mode = #tpu.pipeline_mode<synchronous>, transform_indices = @transform_2, window_bounds = array<i64: 32, 128>}, {pipeline_mode = #tpu.pipeline_mode<synchronous>, transform_indices = @transform_3, window_bounds = array<i64: 1, 128>}, {transform_indices = @transform_4, window_bounds = array<i64: 8, 128>}]} {
    %c0 = arith.constant 0 : index
    %c0_0 = arith.constant 0 : index
    %0 = vector.load %arg1[%c0, %c0_0] : memref<8x1xi32, #tpu.memory_space<vmem>>, vector<8x1xi32>
    %1 = tpu.iota {dimensions = array<i32: 1>} : vector<8x10xi32>
    %2 = vector.broadcast %0 : vector<8x1xi32> to vector<8x10xi32>
    %3 = arith.cmpi eq, %1, %2 : vector<8x10xi32>
    %4 = arith.extui %3 : vector<8x10xi1> to vector<8x10xi32>
    %5 = arith.sitofp %4 : vector<8x10xi32> to vector<8x10xf32>
    %6 = arith.truncf %5 : vector<8x10xf32> to vector<8x10xbf16>
    %c0_1 = arith.constant 0 : index
    %c0_2 = arith.constant 0 : index
    %7 = vector.load %arg2[%c0_1, %c0_2] : memref<10x32xbf16, #tpu.memory_space<vmem>>, vector<10x32xbf16>
    %cst = arith.constant dense<0.000000e+00> : vector<8x32xf32>
    %8 = tpu.matmul %6, %7, %cst {dimension_numbers = #tpu.dot_dimension_numbers<[1], [0], [0], [1], [0, 0, 1, 1], [], []>} : vector<8x10xbf16>, vector<10x32xbf16>, vector<8x32xf32> -> vector<8x32xf32>
    %9 = arith.truncf %8 : vector<8x32xf32> to vector<8x32xbf16>
    %c0_3 = arith.constant 0 : index
    %c0_4 = arith.constant 0 : index
    %10 = vector.load %arg3[%c0_3, %c0_4] : memref<32x128xbf16, #tpu.memory_space<vmem>>, vector<32x128xbf16>
    %cst_5 = arith.constant dense<0.000000e+00> : vector<8x128xf32>
    %11 = tpu.matmul %9, %10, %cst_5 {dimension_numbers = #tpu.dot_dimension_numbers<[1], [0], [0], [1], [0, 0, 1, 1], [], []>} : vector<8x32xbf16>, vector<32x128xbf16>, vector<8x128xf32> -> vector<8x128xf32>
    %c0_6 = arith.constant 0 : index
    %c0_7 = arith.constant 0 : index
    %12 = vector.load %arg4[%c0_6, %c0_7] : memref<1x128xf32, #tpu.memory_space<vmem>>, vector<1x128xf32>
    %13 = vector.broadcast %12 : vector<1x128xf32> to vector<8x128xf32>
    %14 = arith.addf %11, %13 : vector<8x128xf32>
    %c0_8 = arith.constant 0 : index
    %c0_9 = arith.constant 0 : index
    %15 = vector.load %arg5[%c0_8, %c0_9] : memref<8x128xf32, #tpu.memory_space<vmem>>, vector<8x128xf32>
    tpu.vector_store %arg5[%c0_8, %c0_9], %14 {strides = array<i32>} : memref<8x128xf32, #tpu.memory_space<vmem>>, vector<8x128xf32>,
    return
  }
  func.func @transform_0(%arg0: i32) -> (i32, i32) {
    %c0_i32 = arith.constant 0 : i32
    %c0_i32_0 = arith.constant 0 : i32
    return %arg0, %c0_i32 : i32, i32
  }
  func.func @transform_1(%arg0: i32) -> (i32, i32) {
    %c0_i32 = arith.constant 0 : i32
    %c0_i32_0 = arith.constant 0 : i32
    %c0_i32_1 = arith.constant 0 : i32
    return %c0_i32, %c0_i32_0 : i32, i32
  }
  func.func @transform_2(%arg0: i32) -> (i32, i32) {
    %c0_i32 = arith.constant 0 : i32
    %c0_i32_0 = arith.constant 0 : i32
    %c0_i32_1 = arith.constant 0 : i32
    return %c0_i32, %c0_i32_0 : i32, i32
  }
  func.func @transform_3(%arg0: i32) -> (i32, i32) {
    %c0_i32 = arith.constant 0 : i32
    %c0_i32_0 = arith.constant 0 : i32
    %c0_i32_1 = arith.constant 0 : i32
    return %c0_i32, %c0_i32_0 : i32, i32
  }
  func.func @transform_4(%arg0: i32) -> (i32, i32) {
    %c0_i32 = arith.constant 0 : i32
    %c0_i32_0 = arith.constant 0 : i32
    return %arg0, %c0_i32 : i32, i32
  }
}

</mosaic_0001>

<bundles_post_ra>
// kernel: tpu_custom_call.1
= control target key start
LH: loop header
LB: loop body
LE: loop exit
PB: predicated region body
PF: predicated region fallthrough
CT: control target
= control target key end

     0   :  { %9 = vsyncpa [#allocation3], 0  ;;  %s335_s0 = inlined_call_operand.vmem [shape: s32[8,1], index: 0, kind: input, shape index: {}]   ;;  %s336_s1 = inlined_call_operand.hbm [shape: bf16[10,32], index: 1, kind: input, shape index: {}]   ;;  %s337_s2 = inlined_call_operand.vmem [shape: bf16[32,128], index: 2, kind: input, shape index: {}]   ;;  %s338_s3 = inlined_call_operand.vmem [shape: f32[1,128], index: 3, kind: input, shape index: {}]   ;;  %s339_s4 = inlined_call_operand.hbm [shape: f32[8,128], index: 4, kind: output, shape index: {}]  }
   0x1   :  { %10 = vsyncpa [#allocation4], 0  ;;  %s267_s15 = smov [#allocation2]   ;;  %s219_s19 = scalar_lea.hbm %s336_s1, 128 }
   0x2   :  { %s18_s16 = sshll.u32 %s267_s15, 4  ;;  %p220_p0 = scmp.ne.s32.totalorder %s336_s1, %s219_s19  ;;  %s19_s16 = int_to_ptr.vmem [resolvable:$true] %s18_s16 }
   0x3   :  { %p223_p1 = scmp.lt.u32.totalorder %s219_s19, %s336_s1 }
   0x5   :  { %p225_p2 = pnand %p223_p1, %p220_p0 }
   0x7   :  { %228 = shalt.err (!%p225_p2)
}
   0x8   :  { %s229_s24 = scalar_lea.vmem %s19_s16, 128  ;;  %p234_p4 = scmp.lt.s32.totalorder %s19_s16, %s19_s16 }
   0x9   :  { %p230_p3 = scmp.ne.s32.totalorder %s19_s16, %s229_s24  ;;  %p235_p5 = scmp.lt.s32.totalorder %s229_s24, %s229_s24 }
   0xb   :  { %p236_p6 = por %p235_p5, %p234_p4 }
   0xd   :  { %p237_p7 = pnand %p236_p6, %p230_p3 }
   0xf   :  { %240 = shalt.err (!%p237_p7)
}
  0x10   :  { %s268_s25 = smov 64   ;;  %s269_s26 = smov 4  }
  0x11   :  { %24 = dma.hbm_to_vmem [thread:$0]  %s336_s1, 128, %s19_s16, [#allocation3], %s268_s25, %s268_s25, %s269_s26  }
  0x12   :  { %263 = dma.done.wait [#allocation3], 128  }
  0x13   :  { %264 = vsyncadd [#allocation3], 4294967168  ;;  %v270_v0 = vmov 0   ;;  %v271_v1 = vmov 0.0   ;;  %v33_v2 = vld [vmem:[%s335_s0] sm:$0xff]  ;;  %vm54_vm0 = vcmask 1044480   ;;  %v34_v6 = vlaneseq }
  0x14   :  { %215 = vset.pattern.permute.xlu0 %v270_v0  ;;  %194 = vmatprep.subr.bf16.mxu0 %v271_v1  ;;  %v216_v3 = vld [vmem:[#allocation2] sm:$0x1f]   ;;  %vm272_vm1 = vmmov 0   ;;  %v217_v5 = vld [vmem:[%s337_s2] sm:$0xff]   ;;  %vm50_vm3 = vcmask 80896   ;;  %v218_v11 = vld [vmem:[%s337_s2 + $0x8] sm:$0xff]  }
  0x15   :  { %200 = vmatprep.subr.bf16.mxu1 %v271_v1  ;;  %37 = vperm.xlu0 %215, %v33_v2   ;;  %v56_v4 = vsel %vm54_vm0, %v216_v3, 0  ;;  %v35_v7 = vand.u32 127, %v34_v6  ;;  %vm122_vm4 = vcmask 261120   ;;  %v185_v17 = vld [vmem:[%s338_s3] ss:$0 sm:$0xff]  ;;  %s273_s9 = smov [#allocation5]  }
  0x16   :  { %195 = vmatpush3.bf16.msra.mxu0 %v56_v4  ;;  %196 = vmatprep.mubr.msk.bf16.mxu0 %vm272_vm1, %v271_v1  ;;  %s173_s10 = sshll.u32 %s273_s9, 4  ;;  %s174_s10 = int_to_ptr.vmem [resolvable:$true] %s173_s10 }
  0x17   :  { %204 = vmatprep.mubr.msk.bf16.mxu1 %vm272_vm1, %v271_v1  ;;  %201 = vmatpush3.bf16.msra.mxu1 %v217_v5  ;;  %s241_s2 = scalar_lea.vmem %s174_s10, 128  ;;  %p246_p9 = scmp.lt.s32.totalorder %s174_s10, %s174_s10 }
  0x18   :  { %202 = vmatprep.subr.bf16.mxu1 %v271_v1  ;;  %p242_p8 = scmp.ne.s32.totalorder %s174_s10, %s241_s2  ;;  %p247_p10 = scmp.lt.s32.totalorder %s241_s2, %s241_s2 }
  0x1a   :  { %p248_p11 = por %p247_p10, %p246_p9 }
  0x1b   :  { %203 = vmatpush3.bf16.msra.mxu1 %v218_v11 }
  0x1c   :  { %p249_p12 = pnand %p248_p11, %p242_p8 }
  0x94   :  { %v38_v8 = vpop.permute.xlu0 %37 }
  0x95   :  { %vm39_vm2 = vcmp.eq.s32.totalorder %v35_v7, %v38_v8 }
  0x96   :  { %v182_v9 = vsel %vm39_vm2, 1.0, %v271_v1 }
  0x97   :  { %v42_v10 = vpack.c.bf16 %v182_v9, %v182_v9 }
  0x99   :  { %197 = vmatmul.mubr.msk.bf16.vlgmr.msra.gmra.mrb[0].mxu0 %vm50_vm3, %v42_v10 }
 0x16c   :  { %v92_v12 = vpop.f32.mrb[0].mxu0 }
 0x16d   :  { %v98_v13 = vpack.c.bf16 %v92_v12, %v92_v12  ;;  %v198_v14 = vpop.f32.mrb[1].mxu0 }
 0x16e   :  { %v95_v15 = vpop.f32.mrb[2].mxu0 }
 0x16f   :  { %v199_v16 = vpop.f32.mrb[3].mxu0  ;;  %205 = vmatmul.mubr.msk.bf16.vlgmr.msra.gmra.mrb[0].mxu1 %vm122_vm4, %v98_v13 }
 0x242   :  { %v160_v18 = vpop.f32.mrb[0].mxu1 }
 0x243   :  { %v161_v19 = vadd.f32 %v185_v17, %v160_v18  ;;  %v206_v20 = vpop.f32.mrb[1].mxu1 }
 0x244   :  { %v163_v21 = vpop.f32.mrb[2].mxu1 }
 0x245   :  { %166 = vst [vmem:[#allocation5] sm:$0xff] %v161_v19  ;;  %v207_v22 = vpop.f32.mrb[3].mxu1 }
 0x246   :  { %252 = shalt.err (!%p249_p12)
}
 0x247   :  { %s253_s3 = scalar_lea.hbm %s339_s4, 128 }
 0x248   :  { %p254_p13 = scmp.ne.s32.totalorder %s339_s4, %s253_s3  ;;  %p257_p0 = scmp.lt.u32.totalorder %s253_s3, %s339_s4 }
 0x24a   :  { %p259_p1 = pnand %p257_p0, %p254_p13 }
 0x24c   :  { %262 = shalt.err (!%p259_p1)
}
 0x24d   :  { %176 = dma.vmem_to_hbm [thread:$0]  %s174_s10, 128, %s339_s4, [#allocation4]  }
 0x24e   :  { %265 = dma.done.wait [#allocation4], 128  }
 0x24f   :  { %266 = vsyncadd [#allocation4], 4294967168 }
 0x250   :  { %180 = vsyncpa [#allocation3], 1 }
 0x251   :  { %181 = vsyncpa [#allocation4], 1 }

</bundles_post_ra>
